<compile_context>
chip_gen: v5e
topology: v5e:2x2
jax: 0.10.0
libtpu: 0.0.40
codegen_flags: <defaults>
</compile_context>

<pallas_src>
import functools

import jax
import jax.numpy as jnp
from jax.experimental import pallas as pl
from jax.experimental.pallas import tpu as pltpu

DT = 1.0          # self.dT
EPS = 1e-5        # self.epsilon
LN_EPS = 1e-5     # nn.LayerNorm default eps


def _sigmoid(z):
    # One EUP op (tanh) instead of exp + reciprocal.
    return 0.5 * (jnp.tanh(0.5 * z) + 1.0)


def _cell_math(x, h, c, wh, wib, vec, H):
    """Shared NeuroFlexCell step math on f32 VMEM tiles.

    x: (B, 1), h/c: (B, H), wh: (H, 4H),
    wib: (2, 4H) = [Wi row; fused bias], vec: (4, H) = [A; w_tau; gamma; beta].
    """
    x = x.astype(jnp.float32)
    h = h.astype(jnp.float32)
    c = c.astype(jnp.float32)

    wi = wib[0:1, :]            # (1, 4H)
    b = wib[1:2, :]             # (1, 4H)
    a = vec[0:1, :]             # (1, H)
    w_tau = vec[1:2, :]
    gamma = vec[2:3, :]
    beta = vec[3:4, :]

    # nn.LSTMCell gate pre-activations. The input projection is rank-1 (I=1),
    # so it is a VPU broadcast multiply folded into the bias add; only h @ Wh
    # goes through the MXU.
    gates = (jnp.dot(h, wh, preferred_element_type=jnp.float32)
             + (x * wi + b))                              # (B, 4H)
    # NOTE: for H >> 20 the gate blocks should be padded to 128-lane
    # boundaries so these slices are free vreg views; at H=20 it is one vreg.
    i_g = _sigmoid(gates[:, 0:H])
    f_g = _sigmoid(gates[:, H:2 * H])
    g_g = jnp.tanh(gates[:, 2 * H:3 * H])
    o_g = _sigmoid(gates[:, 3 * H:4 * H])
    c_new = f_g * c + i_g * g_g                           # (B, H)
    x_lstm = o_g * jnp.tanh(c_new)                        # x_LSTM_t

    # Liquid-time-constant mixing (I_t = input_t).
    sig_i = _sigmoid(x)                                   # f(I_t), (B, 1)
    exponent = -(w_tau + sig_i) * DT + EPS                # (B, H)
    x_comb = (x_lstm - a) * jnp.exp(exponent) * (1.0 - sig_i) + a + h

    # LayerNorm over the hidden dim (biased variance, eps = 1e-5).
    mean = jnp.mean(x_comb, axis=-1, keepdims=True)
    var = jnp.mean((x_comb - mean) ** 2, axis=-1, keepdims=True)
    y = (x_comb - mean) * jax.lax.rsqrt(var + LN_EPS) * gamma + beta
    return y, c_new


# --------------------------- single-step kernel ---------------------------

def _step_kernel(x_ref, h_ref, c_ref, wh_ref, wib_ref, vec_ref,
                 y_ref, c_out_ref, *, hidden_size):
    y, c_new = _cell_math(x_ref[...], h_ref[...], c_ref[...],
                          wh_ref[...], wib_ref[...], vec_ref[...], hidden_size)
    y_ref[...] = y.astype(y_ref.dtype)
    c_out_ref[...] = c_new.astype(c_out_ref.dtype)


@jax.jit
def neuroflex_forward(params, input_t, hx):
    """One NeuroFlexCell step: returns (x_combined, (h_t, c_t))."""
    h_t, c_t = hx
    B = input_t.shape[0]
    H = h_t.shape[-1]
    assert input_t.shape[-1] == 1, "kernel is specialized to input_size == 1"

    vmem = pl.BlockSpec(memory_space=pltpu.MemorySpace.VMEM)
    kernel = functools.partial(_step_kernel, hidden_size=H)
    y, c_new = pl.pallas_call(
        kernel,
        out_shape=(jax.ShapeDtypeStruct((B, H), jnp.float32),
                   jax.ShapeDtypeStruct((B, H), jnp.float32)),
        in_specs=[vmem] * 6,
        out_specs=(vmem, vmem),
        input_output_aliases={2: 1},          # c_t updated in place
    )(input_t, h_t, c_t, params["wh"], params["wi_b"], params["vec"])
    # forward returns (x_combined, (h_t, c_t)) with h_t = x_combined
    return y, (y, c_new)


# ------------------------- fused time-loop kernel --------------------------

def _seq_kernel(x_ref, h0_ref, c0_ref, wh_ref, wib_ref, vec_ref,
                y_ref, c_out_ref, h_scr, c_scr, *, hidden_size):
    t = pl.program_id(1)

    @pl.when(t == 0)
    def _():
        h_scr[...] = h0_ref[...].astype(jnp.float32)
        c_scr[...] = c0_ref[...].astype(jnp.float32)

    y, c_new = _cell_math(x_ref[0], h_scr[...], c_scr[...],
                          wh_ref[...], wib_ref[...], vec_ref[...], hidden_size)
    y_ref[0] = y.astype(y_ref.dtype)
    c_out_ref[...] = c_new.astype(c_out_ref.dtype)
    h_scr[...] = y            # h_t = x_combined
    c_scr[...] = c_new


@jax.jit
def neuroflex_sequence(params, x_seq, hx):
    """Runs the cell over a (T, B, 1) sequence in a single fused pallas_call.

    Returns (y_seq (T, B, H), (h_T, c_T)). h/c live in VMEM scratch across the
    time grid; only per-step outputs and the final c touch HBM.
    """
    h0, c0 = hx
    T, B, I = x_seq.shape
    H = h0.shape[-1]
    assert I == 1

    block_b = B               # one batch tile at these sizes; the grid axis
    num_b = B // block_b      # lets v7x shard a large B across its 2 TCs

    in_specs = [
        pl.BlockSpec((1, block_b, I), lambda bt, t: (t, bt, 0)),   # x_seq
        pl.BlockSpec((block_b, H), lambda bt, t: (bt, 0)),         # h0
        pl.BlockSpec((block_b, H), lambda bt, t: (bt, 0)),         # c0
        pl.BlockSpec((H, 4 * H), lambda bt, t: (0, 0)),            # Wh
        pl.BlockSpec((2, 4 * H), lambda bt, t: (0, 0)),            # [Wi; b]
        pl.BlockSpec((4, H), lambda bt, t: (0, 0)),                # packed vecs
    ]
    out_specs = (
        pl.BlockSpec((1, block_b, H), lambda bt, t: (t, bt, 0)),   # y per step
        pl.BlockSpec((block_b, H), lambda bt, t: (bt, 0)),         # final c
    )
    kernel = functools.partial(_seq_kernel, hidden_size=H)
    y_seq, c_T = pl.pallas_call(
        kernel,
        grid=(num_b, T),
        in_specs=in_specs,
        out_specs=out_specs,
        out_shape=(jax.ShapeDtypeStruct((T, B, H), jnp.float32),
                   jax.ShapeDtypeStruct((B, H), jnp.float32)),
        scratch_shapes=[pltpu.VMEM((block_b, H), jnp.float32),
                        pltpu.VMEM((block_b, H), jnp.float32)],
        compiler_params=pltpu.CompilerParams(
            dimension_semantics=("parallel", "arbitrary")),
    )(x_seq, h0, c0, params["wh"], params["wi_b"], params["vec"])
    return y_seq, (y_seq[-1], c_T)


# ------------------------------- params / ref -------------------------------

def init_params(key, input_size, hidden_size):
    H, I = hidden_size, input_size
    assert I == 1
    k = 1.0 / jnp.sqrt(jnp.float32(H))      # PyTorch LSTMCell init bound
    ks = jax.random.split(key, 6)
    w_ih = jax.random.uniform(ks[0], (4 * H, I), jnp.float32, -k, k)
    w_hh = jax.random.uniform(ks[1], (4 * H, H), jnp.float32, -k, k)
    b_ih = jax.random.uniform(ks[2], (4 * H,), jnp.float32, -k, k)
    b_hh = jax.random.uniform(ks[3], (4 * H,), jnp.float32, -k, k)
    a = jax.random.uniform(ks[4], (H,), jnp.float32, -0.1, 0.1)
    w_tau = jax.random.uniform(ks[5], (H,), jnp.float32, -0.1, 0.1)
    return {
        "wh": jnp.transpose(w_hh),                         # (H, 4H) for h @ Wh
        "wi_b": jnp.stack([w_ih[:, 0], b_ih + b_hh]),      # (2, 4H)
        "vec": jnp.stack([a, w_tau,
                          jnp.ones((H,), jnp.float32),     # LN gamma
                          jnp.zeros((H,), jnp.float32)]),  # LN beta  -> (4, H)
    }


def _reference_step(params, x, h, c):
    """Pure-JAX reference of the PyTorch forward (exp-based sigmoid)."""
    H = h.shape[-1]
    wi, b = params["wi_b"][0], params["wi_b"][1]
    a, w_tau, gamma, beta = params["vec"]
    sig = lambda z: 1.0 / (1.0 + jnp.exp(-z))
    gates = h @ params["wh"] + x * wi + b
    i_g = sig(gates[:, 0:H])
    f_g = sig(gates[:, H:2 * H])
    g_g = jnp.tanh(gates[:, 2 * H:3 * H])
    o_g = sig(gates[:, 3 * H:4 * H])
    c_new = f_g * c + i_g * g_g
    x_lstm = o_g * jnp.tanh(c_new)
    exponent = -(w_tau + sig(x)) * DT + EPS
    x_comb = (x_lstm - a) * jnp.exp(exponent) * sig(-x) + a + h
    mean = x_comb.mean(-1, keepdims=True)
    var = ((x_comb - mean) ** 2).mean(-1, keepdims=True)
    y = (x_comb - mean) / jnp.sqrt(var + LN_EPS) * gamma + beta
    return y, c_new


if __name__ == "__main__":
    input_size = 1
    hidden_size = 20
    batch = 8
    seq_len = 12

    key = jax.random.PRNGKey(0)
    kp, kx, kh, kc, ks = jax.random.split(key, 5)
    params = init_params(kp, input_size, hidden_size)
    input_t = jax.random.normal(kx, (batch, input_size), jnp.float32)
    h0 = jax.random.normal(kh, (batch, hidden_size), jnp.float32)
    c0 = jax.random.normal(kc, (batch, hidden_size), jnp.float32)
    x_seq = jax.random.normal(ks, (seq_len, batch, input_size), jnp.float32)

    # Pure-JAX references (computed first; the single-step kernel aliases c0's
    # buffer, so the step call is kept as c0's last consumer).
    y_ref, c_ref = _reference_step(params, input_t, h0, c0)
    h_r, c_r = h0, c0
    ys_ref = []
    for t in range(seq_len):
        h_r, c_r = _reference_step(params, x_seq[t], h_r, c_r)
        ys_ref.append(h_r)
    ys_ref = jnp.stack(ys_ref)

    # Fused time-loop kernel: one pallas_call, h/c resident in VMEM.
    y_seq, (h_T, c_T) = neuroflex_sequence(params, x_seq, (h0, c0))
    jax.block_until_ready((y_seq, h_T, c_T))
    assert y_seq.shape == (seq_len, batch, hidden_size)
    assert jnp.allclose(y_seq, ys_ref, atol=1e-3, rtol=1e-3)
    assert jnp.allclose(c_T, c_r, atol=1e-3, rtol=1e-3)

    # Single-step kernel (matches the PyTorch module's forward exactly).
    y, (h1, c1) = neuroflex_forward(params, input_t, (h0, c0))
    jax.block_until_ready((y, h1, c1))
    assert y.shape == (batch, hidden_size) and c1.shape == (batch, hidden_size)
    assert jnp.allclose(y, y_ref, atol=1e-3, rtol=1e-3)
    assert jnp.allclose(c1, c_ref, atol=1e-3, rtol=1e-3)

    print("KERNEL_OK")
</pallas_src>

<mosaic_0001>
module attributes {stable_mosaic.version = 11 : i64} {
  func.func @_seq_kernel(%arg0: i32, %arg1: i32, %arg2: memref<1x8x1xf32, #tpu.memory_space<vmem>>, %arg3: memref<8x20xf32, #tpu.memory_space<vmem>>, %arg4: memref<8x20xf32, #tpu.memory_space<vmem>>, %arg5: memref<20x80xf32, #tpu.memory_space<vmem>>, %arg6: memref<2x80xf32, #tpu.memory_space<vmem>>, %arg7: memref<4x20xf32, #tpu.memory_space<vmem>>, %arg8: memref<1x8x20xf32, #tpu.memory_space<vmem>>, %arg9: memref<8x20xf32, #tpu.memory_space<vmem>>, %arg10: memref<8x20xf32, #tpu.memory_space<vmem>>, %arg11: memref<8x20xf32, #tpu.memory_space<vmem>>) attributes {dimension_semantics = [#tpu.dimension_semantics<parallel>, #tpu.dimension_semantics<arbitrary>], iteration_bounds = array<i64: 1, 12>, scalar_prefetch = 0 : i64, scratch_operands = 2 : i64, tpu.core_type = #tpu.core_type<tc>, window_params = [{transform_indices = @transform_0, window_bounds = array<i64: 1, 8, 1>}, {transform_indices = @transform_1, window_bounds = array<i64: 8, 20>}, {transform_indices = @transform_2, window_bounds = array<i64: 8, 20>}, {pipeline_mode = #tpu.pipeline_mode<synchronous>, transform_indices = @transform_3, window_bounds = array<i64: 20, 80>}, {pipeline_mode = #tpu.pipeline_mode<synchronous>, transform_indices = @transform_4, window_bounds = array<i64: 2, 80>}, {pipeline_mode = #tpu.pipeline_mode<synchronous>, transform_indices = @transform_5, window_bounds = array<i64: 4, 20>}, {transform_indices = @transform_6, window_bounds = array<i64: 1, 8, 20>}, {transform_indices = @transform_7, window_bounds = array<i64: 8, 20>}]} {
    %c0_i32 = arith.constant 0 : i32
    %0 = arith.cmpi eq, %arg1, %c0_i32 : i32
    %1 = arith.extui %0 : i1 to i32
    %c0_i32_0 = arith.constant 0 : i32
    %2 = arith.cmpi ne, %1, %c0_i32_0 : i32
    scf.if %2 {
      %c0_43 = arith.constant 0 : index
      %c0_44 = arith.constant 0 : index
      %109 = vector.load %arg3[%c0_43, %c0_44] : memref<8x20xf32, #tpu.memory_space<vmem>>, vector<8x20xf32>
      %c0_45 = arith.constant 0 : index
      %c0_46 = arith.constant 0 : index
      %110 = vector.load %arg10[%c0_45, %c0_46] : memref<8x20xf32, #tpu.memory_space<vmem>>, vector<8x20xf32>
      tpu.vector_store %arg10[%c0_45, %c0_46], %109 {strides = array<i32>} : memref<8x20xf32, #tpu.memory_space<vmem>>, vector<8x20xf32>,
      %c0_47 = arith.constant 0 : index
      %c0_48 = arith.constant 0 : index
      %111 = vector.load %arg4[%c0_47, %c0_48] : memref<8x20xf32, #tpu.memory_space<vmem>>, vector<8x20xf32>
      %c0_49 = arith.constant 0 : index
      %c0_50 = arith.constant 0 : index
      %112 = vector.load %arg11[%c0_49, %c0_50] : memref<8x20xf32, #tpu.memory_space<vmem>>, vector<8x20xf32>
      tpu.vector_store %arg11[%c0_49, %c0_50], %111 {strides = array<i32>} : memref<8x20xf32, #tpu.memory_space<vmem>>, vector<8x20xf32>,
    } else {
    }
    %c0 = arith.constant 0 : index
    %c0_1 = arith.constant 0 : index
    %c0_2 = arith.constant 0 : index
    %3 = vector.load %arg2[%c0, %c0_1, %c0_2] : memref<1x8x1xf32, #tpu.memory_space<vmem>>, vector<1x8x1xf32>
    %4 = vector.shape_cast %3 : vector<1x8x1xf32> to vector<8x1xf32>
    %c0_3 = arith.constant 0 : index
    %c0_4 = arith.constant 0 : index
    %5 = vector.load %arg10[%c0_3, %c0_4] : memref<8x20xf32, #tpu.memory_space<vmem>>, vector<8x20xf32>
    %c0_5 = arith.constant 0 : index
    %c0_6 = arith.constant 0 : index
    %6 = vector.load %arg11[%c0_5, %c0_6] : memref<8x20xf32, #tpu.memory_space<vmem>>, vector<8x20xf32>
    %c0_7 = arith.constant 0 : index
    %c0_8 = arith.constant 0 : index
    %7 = vector.load %arg5[%c0_7, %c0_8] : memref<20x80xf32, #tpu.memory_space<vmem>>, vector<20x80xf32>
    %c0_9 = arith.constant 0 : index
    %c0_10 = arith.constant 0 : index
    %8 = vector.load %arg6[%c0_9, %c0_10] : memref<2x80xf32, #tpu.memory_space<vmem>>, vector<2x80xf32>
    %c0_11 = arith.constant 0 : index
    %c0_12 = arith.constant 0 : index
    %9 = vector.load %arg7[%c0_11, %c0_12] : memref<4x20xf32, #tpu.memory_space<vmem>>, vector<4x20xf32>
    %10 = vector.extract_strided_slice %8 {offsets = [0, 0], sizes = [1, 80], strides = [1, 1]} : vector<2x80xf32> to vector<1x80xf32>
    %11 = vector.extract_strided_slice %8 {offsets = [1, 0], sizes = [1, 80], strides = [1, 1]} : vector<2x80xf32> to vector<1x80xf32>
    %12 = vector.extract_strided_slice %9 {offsets = [0, 0], sizes = [1, 20], strides = [1, 1]} : vector<4x20xf32> to vector<1x20xf32>
    %13 = vector.extract_strided_slice %9 {offsets = [1, 0], sizes = [1, 20], strides = [1, 1]} : vector<4x20xf32> to vector<1x20xf32>
    %14 = vector.extract_strided_slice %9 {offsets = [2, 0], sizes = [1, 20], strides = [1, 1]} : vector<4x20xf32> to vector<1x20xf32>
    %15 = vector.extract_strided_slice %9 {offsets = [3, 0], sizes = [1, 20], strides = [1, 1]} : vector<4x20xf32> to vector<1x20xf32>
    %cst = arith.constant dense<0.000000e+00> : vector<8x80xf32>
    %16 = tpu.matmul %5, %7, %cst {dimension_numbers = #tpu.dot_dimension_numbers<[1], [0], [0], [1], [0, 0, 1, 1], [], []>} : vector<8x20xf32>, vector<20x80xf32>, vector<8x80xf32> -> vector<8x80xf32>
    %17 = vector.broadcast %4 : vector<8x1xf32> to vector<8x80xf32>
    %18 = vector.broadcast %10 : vector<1x80xf32> to vector<8x80xf32>
    %19 = arith.mulf %17, %18 : vector<8x80xf32>
    %20 = vector.broadcast %11 : vector<1x80xf32> to vector<8x80xf32>
    %21 = arith.addf %19, %20 : vector<8x80xf32>
    %22 = arith.addf %16, %21 : vector<8x80xf32>
    %23 = vector.extract_strided_slice %22 {offsets = [0, 0], sizes = [8, 20], strides = [1, 1]} : vector<8x80xf32> to vector<8x20xf32>
    %cst_13 = arith.constant 5.000000e-01 : f32
    %24 = vector.broadcast %cst_13 : f32 to vector<8x20xf32>
    %25 = arith.mulf %24, %23 : vector<8x20xf32>
    %26 = math.tanh %25 : vector<8x20xf32>
    %cst_14 = arith.constant 1.000000e+00 : f32
    %27 = vector.broadcast %cst_14 : f32 to vector<8x20xf32>
    %28 = arith.addf %26, %27 : vector<8x20xf32>
    %cst_15 = arith.constant 5.000000e-01 : f32
    %29 = vector.broadcast %cst_15 : f32 to vector<8x20xf32>
    %30 = arith.mulf %29, %28 : vector<8x20xf32>
    %31 = vector.extract_strided_slice %22 {offsets = [0, 20], sizes = [8, 20], strides = [1, 1]} : vector<8x80xf32> to vector<8x20xf32>
    %cst_16 = arith.constant 5.000000e-01 : f32
    %32 = vector.broadcast %cst_16 : f32 to vector<8x20xf32>
    %33 = arith.mulf %32, %31 : vector<8x20xf32>
    %34 = math.tanh %33 : vector<8x20xf32>
    %cst_17 = arith.constant 1.000000e+00 : f32
    %35 = vector.broadcast %cst_17 : f32 to vector<8x20xf32>
    %36 = arith.addf %34, %35 : vector<8x20xf32>
    %cst_18 = arith.constant 5.000000e-01 : f32
    %37 = vector.broadcast %cst_18 : f32 to vector<8x20xf32>
    %38 = arith.mulf %37, %36 : vector<8x20xf32>
    %39 = vector.extract_strided_slice %22 {offsets = [0, 40], sizes = [8, 20], strides = [1, 1]} : vector<8x80xf32> to vector<8x20xf32>
    %40 = math.tanh %39 : vector<8x20xf32>
    %41 = vector.extract_strided_slice %22 {offsets = [0, 60], sizes = [8, 20], strides = [1, 1]} : vector<8x80xf32> to vector<8x20xf32>
    %cst_19 = arith.constant 5.000000e-01 : f32
    %42 = vector.broadcast %cst_19 : f32 to vector<8x20xf32>
    %43 = arith.mulf %42, %41 : vector<8x20xf32>
    %44 = math.tanh %43 : vector<8x20xf32>
    %cst_20 = arith.constant 1.000000e+00 : f32
    %45 = vector.broadcast %cst_20 : f32 to vector<8x20xf32>
    %46 = arith.addf %44, %45 : vector<8x20xf32>
    %cst_21 = arith.constant 5.000000e-01 : f32
    %47 = vector.broadcast %cst_21 : f32 to vector<8x20xf32>
    %48 = arith.mulf %47, %46 : vector<8x20xf32>
    %49 = arith.mulf %38, %6 : vector<8x20xf32>
    %50 = arith.mulf %30, %40 : vector<8x20xf32>
    %51 = arith.addf %49, %50 : vector<8x20xf32>
    %52 = math.tanh %51 : vector<8x20xf32>
    %53 = arith.mulf %48, %52 : vector<8x20xf32>
    %cst_22 = arith.constant 5.000000e-01 : f32
    %54 = vector.broadcast %cst_22 : f32 to vector<8x1xf32>
    %55 = arith.mulf %54, %4 : vector<8x1xf32>
    %56 = math.tanh %55 : vector<8x1xf32>
    %cst_23 = arith.constant 1.000000e+00 : f32
    %57 = vector.broadcast %cst_23 : f32 to vector<8x1xf32>
    %58 = arith.addf %56, %57 : vector<8x1xf32>
    %cst_24 = arith.constant 5.000000e-01 : f32
    %59 = vector.broadcast %cst_24 : f32 to vector<8x1xf32>
    %60 = arith.mulf %59, %58 : vector<8x1xf32>
    %61 = vector.broadcast %13 : vector<1x20xf32> to vector<8x20xf32>
    %62 = vector.broadcast %60 : vector<8x1xf32> to vector<8x20xf32>
    %63 = arith.addf %61, %62 : vector<8x20xf32>
    %cst_25 = arith.constant 0.000000e+00 : f32
    %64 = vector.broadcast %cst_25 : f32 to vector<8x20xf32>
    %65 = arith.subf %64, %63 : vector<8x20xf32>
    %cst_26 = arith.constant 1.000000e+00 : f32
    %66 = vector.broadcast %cst_26 : f32 to vector<8x20xf32>
    %67 = arith.mulf %65, %66 : vector<8x20xf32>
    %cst_27 = arith.constant 9.99999974E-6 : f32
    %68 = vector.broadcast %cst_27 : f32 to vector<8x20xf32>
    %69 = arith.addf %67, %68 : vector<8x20xf32>
    %70 = vector.broadcast %12 : vector<1x20xf32> to vector<8x20xf32>
    %71 = arith.subf %53, %70 : vector<8x20xf32>
    %72 = math.exp %69 : vector<8x20xf32>
    %73 = arith.mulf %71, %72 : vector<8x20xf32>
    %cst_28 = arith.constant 1.000000e+00 : f32
    %74 = vector.broadcast %cst_28 : f32 to vector<8x1xf32>
    %75 = arith.subf %74, %60 : vector<8x1xf32>
    %76 = vector.broadcast %75 : vector<8x1xf32> to vector<8x20xf32>
    %77 = arith.mulf %73, %76 : vector<8x20xf32>
    %78 = vector.broadcast %12 : vector<1x20xf32> to vector<8x20xf32>
    %79 = arith.addf %77, %78 : vector<8x20xf32>
    %80 = arith.addf %79, %5 : vector<8x20xf32>
    %cst_29 = arith.constant dense<0.000000e+00> : vector<8xf32>
    %81 = vector.multi_reduction <add>, %80, %cst_29 [1] : vector<8x20xf32> to vector<8xf32>
    %82 = vector.shape_cast %81 : vector<8xf32> to vector<8x1xf32>
    %cst_30 = arith.constant 2.000000e+01 : f32
    %83 = vector.broadcast %cst_30 : f32 to vector<8x1xf32>
    %84 = arith.divf %82, %83 : vector<8x1xf32>
    %85 = vector.broadcast %84 : vector<8x1xf32> to vector<8x20xf32>
    %86 = arith.subf %80, %85 : vector<8x20xf32>
    %87 = arith.mulf %86, %86 : vector<8x20xf32>
    %cst_31 = arith.constant dense<0.000000e+00> : vector<8xf32>
    %88 = vector.multi_reduction <add>, %87, %cst_31 [1] : vector<8x20xf32> to vector<8xf32>
    %89 = vector.shape_cast %88 : vector<8xf32> to vector<8x1xf32>
    %cst_32 = arith.constant 2.000000e+01 : f32
    %90 = vector.broadcast %cst_32 : f32 to vector<8x1xf32>
    %91 = arith.divf %89, %90 : vector<8x1xf32>
    %92 = vector.broadcast %84 : vector<8x1xf32> to vector<8x20xf32>
    %93 = arith.subf %80, %92 : vector<8x20xf32>
    %cst_33 = arith.constant 9.99999974E-6 : f32
    %94 = vector.broadcast %cst_33 : f32 to vector<8x1xf32>
    %95 = arith.addf %91, %94 : vector<8x1xf32>
    %96 = math.rsqrt %95 : vector<8x1xf32>
    %97 = vector.broadcast %96 : vector<8x1xf32> to vector<8x20xf32>
    %98 = arith.mulf %93, %97 : vector<8x20xf32>
    %99 = vector.broadcast %14 : vector<1x20xf32> to vector<8x20xf32>
    %100 = arith.mulf %98, %99 : vector<8x20xf32>
    %101 = vector.broadcast %15 : vector<1x20xf32> to vector<8x20xf32>
    %102 = arith.addf %100, %101 : vector<8x20xf32>
    %c0_34 = arith.constant 0 : index
    %c0_35 = arith.constant 0 : index
    %c0_36 = arith.constant 0 : index
    %103 = vector.load %arg8[%c0_34, %c0_35, %c0_36] : memref<1x8x20xf32, #tpu.memory_space<vmem>>, vector<1x8x20xf32>
    %104 = vector.shape_cast %103 : vector<1x8x20xf32> to vector<8x20xf32>
    %105 = vector.shape_cast %102 : vector<8x20xf32> to vector<1x8x20xf32>
    tpu.vector_store %arg8[%c0_34, %c0_35, %c0_36], %105 {strides = array<i32>} : memref<1x8x20xf32, #tpu.memory_space<vmem>>, vector<1x8x20xf32>,
    %c0_37 = arith.constant 0 : index
    %c0_38 = arith.constant 0 : index
    %106 = vector.load %arg9[%c0_37, %c0_38] : memref<8x20xf32, #tpu.memory_space<vmem>>, vector<8x20xf32>
    tpu.vector_store %arg9[%c0_37, %c0_38], %51 {strides = array<i32>} : memref<8x20xf32, #tpu.memory_space<vmem>>, vector<8x20xf32>,
    %c0_39 = arith.constant 0 : index
    %c0_40 = arith.constant 0 : index
    %107 = vector.load %arg10[%c0_39, %c0_40] : memref<8x20xf32, #tpu.memory_space<vmem>>, vector<8x20xf32>
    tpu.vector_store %arg10[%c0_39, %c0_40], %102 {strides = array<i32>} : memref<8x20xf32, #tpu.memory_space<vmem>>, vector<8x20xf32>,
    %c0_41 = arith.constant 0 : index
    %c0_42 = arith.constant 0 : index
    %108 = vector.load %arg11[%c0_41, %c0_42] : memref<8x20xf32, #tpu.memory_space<vmem>>, vector<8x20xf32>
    tpu.vector_store %arg11[%c0_41, %c0_42], %51 {strides = array<i32>} : memref<8x20xf32, #tpu.memory_space<vmem>>, vector<8x20xf32>,
    return
  }
  func.func @transform_0(%arg0: i32, %arg1: i32) -> (i32, i32, i32) {
    %c0_i32 = arith.constant 0 : i32
    %c0_i32_0 = arith.constant 0 : i32
    return %arg1, %arg0, %c0_i32 : i32, i32, i32
  }
  func.func @transform_1(%arg0: i32, %arg1: i32) -> (i32, i32) {
    %c0_i32 = arith.constant 0 : i32
    %c0_i32_0 = arith.constant 0 : i32
    return %arg0, %c0_i32 : i32, i32
  }
  func.func @transform_2(%arg0: i32, %arg1: i32) -> (i32, i32) {
    %c0_i32 = arith.constant 0 : i32
    %c0_i32_0 = arith.constant 0 : i32
    return %arg0, %c0_i32 : i32, i32
  }
  func.func @transform_3(%arg0: i32, %arg1: i32) -> (i32, i32) {
    %c0_i32 = arith.constant 0 : i32
    %c0_i32_0 = arith.constant 0 : i32
    %c0_i32_1 = arith.constant 0 : i32
    return %c0_i32, %c0_i32_0 : i32, i32
  }
  func.func @transform_4(%arg0: i32, %arg1: i32) -> (i32, i32) {
    %c0_i32 = arith.constant 0 : i32
    %c0_i32_0 = arith.constant 0 : i32
    %c0_i32_1 = arith.constant 0 : i32
    return %c0_i32, %c0_i32_0 : i32, i32
  }
  func.func @transform_5(%arg0: i32, %arg1: i32) -> (i32, i32) {
    %c0_i32 = arith.constant 0 : i32
    %c0_i32_0 = arith.constant 0 : i32
    %c0_i32_1 = arith.constant 0 : i32
    return %c0_i32, %c0_i32_0 : i32, i32
  }
  func.func @transform_6(%arg0: i32, %arg1: i32) -> (i32, i32, i32) {
    %c0_i32 = arith.constant 0 : i32
    %c0_i32_0 = arith.constant 0 : i32
    return %arg1, %arg0, %c0_i32 : i32, i32, i32
  }
  func.func @transform_7(%arg0: i32, %arg1: i32) -> (i32, i32) {
    %c0_i32 = arith.constant 0 : i32
    %c0_i32_0 = arith.constant 0 : i32
    return %arg0, %c0_i32 : i32, i32
  }
}

</mosaic_0001>

<bundles_post_ra>
// kernel: neuroflex_sequence.1
= control target key start
LH: loop header
LB: loop body
LE: loop exit
PB: predicated region body
PF: predicated region fallthrough
CT: control target
= control target key end

     0   :  { %13 = vsyncpa [#allocation5], 0  ;;  %s834_s24 = smov 0   ;;  %s836_s25 = smov 0   ;;  %s930_s0 = inlined_call_operand.vmem [shape: f32[12,8,1], index: 0, kind: input, shape index: {}]   ;;  %s931_s1 = inlined_call_operand.vmem [shape: f32[8,20], index: 1, kind: input, shape index: {}]   ;;  %s932_s2 = inlined_call_operand.vmem [shape: f32[8,20], index: 2, kind: input, shape index: {}]   ;;  %s933_s3 = inlined_call_operand.vmem [shape: f32[20,80], index: 3, kind: input, shape index: {}]   ;;  %s934_s4 = inlined_call_operand.vmem [shape: f32[2,80], index: 4, kind: input, shape index: {}]   ;;  %s935_s5 = inlined_call_operand.vmem [shape: f32[4,20], index: 5, kind: input, shape index: {}]   ;;  %s936_s6 = inlined_call_operand.vmem [shape: f32[12,8,20], index: 6, kind: output, shape index: {0}]   ;;  %s937_s7 = inlined_call_operand.hbm [shape: f32[8,20], index: 7, kind: output, shape index: {1}]  }
   0x1   :  { %s838_s26 = smov 0  }
   0x2 LB: > { %s657_s27 = sadd.s32 4294967295, %s783_s26   ;;  %s28_s28 = sadd.s32 1, %s779_s25  ;;  %s783_s26 = sphi %s838_s26, %s19_s26   ;;  %s779_s25 = sphi %s836_s25, %s940_s25   ;;  %s775_s24 = sphi %s834_s24, %s939_s24  }
   0x3   : > { %p29_p0 = scmp.ge.s32.totalorder %s28_s28, 12  ;;  %p663_p1 = scmp.ge.s32.totalorder %s783_s26, 1 }
   0x4   : > { %p277_p2 = scmp.lt.s32.totalorder %s783_s26, 13 }
   0x5   : > { %s942_s28 = smov (%p29_p0, %s28_s28), 0 }
   0x6   : > { %p278_p3 = pnand %p663_p1, %p277_p2 }
   0x7   : > { %p321_p4 = scmp.lt.s32.totalorder (!%p278_p3), %s775_s24, 11  ;;  %p666_p5 = scmp.ne.s32.totalorder (!%p278_p3), %s775_s24, 0 }
   0x8   : > { %281 = sbr.rel (%p278_p3) target bundleno = 1102 (0x44e), region = 44 }
   0xd   : > { %s322_s29 = scalar_select %p321_p4, %s775_s24, 11 }
   0xe   : > { %346 = sbr.rel (%p666_p5) target bundleno = 22 (0x16), region = 48 }
   0xf   : > { %s664_s30 = sshll.u32 %s322_s29, 3 }
  0x10   : > { %s327_s10 = scalar_lea.vmem %s930_s0, %s664_s30  ;;  %s859_s13 = scalar_lea.vmem %s936_s6, %s664_s30 }
  0x13   : > { %v347_v0 = vld [vmem:[%s931_s1] sm:$0xff]  ;;  %vm348_vm0 = vcmask 162816  }
  0x14   : > { %v350_v1 = vld [vmem:[%s932_s2] sm:$0xff]  ;;  %349 = vst.msk [vmem:[#allocation2] sm:$0xff] %vm348_vm0, %v347_v0 }
  0x15   : > { %351 = vst.msk [vmem:[#allocation3] sm:$0xff] %vm348_vm0, %v350_v1 }
  0x16 PF: > { %v357_v2 = vld [vmem:[%s933_s3 + $0x10] sm:$0xf]  ;;  %vm373_vm1 = vcmask 1043456   ;;  %v356_v3 = vld [vmem:[%s933_s3 + $0x8] sm:$0xff]  ;;  %v352_v4 = vld [vmem:[%s327_s10] sm:$0xff]  ;;  %v785_v7 = vmov 0  }
  0x17   : > { %667 = vmatpush.msk.msra.mxu0 %vm373_vm1, %v357_v2  ;;  %v355_v6 = vld [vmem:[%s933_s3] sm:$0xff]  ;;  %712 = vset.pattern.permute.xlu0 %v785_v7  ;;  %s786_s24 = smov 20   ;;  %vm369_vm2 = vcmask 162816   ;;  %v423_v9 = vmul.f32 0.5, %v352_v4  ;;  %s787_s8 = smov 88   ;;  %v791_v56 = vmov 20.0  }
  0x18   : > { %362 = vperm.xlu0 %712, %v352_v4   ;;  %713 = vset.pattern.permute.xlu1 %v785_v7  ;;  %v358_v13 = vld [vmem:[%s934_s4] sm:$0x3]  ;;  %s788_s11 = smov 60   ;;  %s789_s12 = smov 40  }
  0x19   : > { %391 = vmatpush.msra.mxu0 %v356_v3  ;;  %714 = vset.pattern.permute.xlu2 %v785_v7  ;;  %715 = vtanh.f32 %v423_v9  ;;  %v365_v14 = vperm.slane %v358_v13, 0  ;;  %v367_v17 = vperm.slane %v358_v13, 1  ;;  %v884_v23 = vld [vmem:[%s935_s5] sm:$0xf]  ;;  %s790_s14 = smov 68   ;;  %s792_s15 = smov 108  }
  0x1a   : > { %v436_v24 = vperm.slane %v884_v23, 0  ;;  %v427_v25 = vperm.slane %v884_v23, 1  ;;  %v498_v3 = vperm.slane %v884_v23, 2  ;;  %v504_v4 = vperm.slane %v884_v23, 3  ;;  %p904_p6 = scmp.eq.s32.totalorder %s657_s27, 11  ;;  %s793_s17 = smov [#allocation4]  }
  0x1b   : > { %v353_v8 = vld [vmem:[#allocation2] sm:$0xff]  ;;  %392 = vmatpush.msra.mxu0 %v355_v6  ;;  %s540_s18 = sshll.u32 %s793_s17, 4  ;;  %s542_s21 = sshll.u32 %s937_s7, 4  ;;  %s541_s18 = int_to_ptr.vmem [resolvable:$true] %s540_s18  ;;  %s543_s21 = int_to_ptr.hbm [resolvable:$true] %s542_s21 }
  0x1c   : > { %v354_v5 = vld [vmem:[#allocation3] sm:$0xff]  ;;  %668 = vmatmul.msk.f32.vlgmr.msra.gmra.mxu0 %vm369_vm2, %v353_v8 }
  0x1d   : > { %403 = vrot.lane.b32.xlu1 %v354_v5, %s786_s24 }
  0x1f   : > { %v716_v10 = vpop.eup %715 }
  0x20   : > { %v425_v11 = vadd.f32 1.0, %v716_v10 }
  0x22   : > { %v426_v12 = vmul.f32 0.5, %v425_v11 }
  0x24   : > { %v449_v42 = vsub.f32 1.0, %v426_v12 }
  0x25   : > { %430 = vperm.xlu1 %713, %v426_v12  }
  0x8a   : > { %v363_v15 = vpop.permute.xlu0 %362 }
  0x8b   : > { %v366_v16 = vmul.f32 %v365_v14, %v363_v15 }
  0x8d   : > { %v368_v18 = vadd.f32 %v367_v17, %v366_v16 }
  0x8f   : > { %v404_v22 = vpop.permute.xlu1 %403 }
  0x97   : > { %v431_v26 = vpop.permute.xlu1 %430 }
  0x98   : > { %v433_v27 = vadd.f32 %v431_v26, %v427_v25 }
  0x99   : > { %v394_v19 = vpop.f32.mrf.mxu0 }
  0x9a   : > { %v395_v20 = vadd.f32 %v394_v19, %v368_v18  ;;  %v434_v28 = vsub.f32 0.0, %v433_v27 }
  0x9c   : > { %717 = vtanh.f32 %v395_v20  ;;  %v435_v29 = vadd.f32 1e-05, %v434_v28  ;;  %v397_v30 = vmul.f32 0.5, %v395_v20 }
  0x9e   : > { %v442_v31 = vmul.f32 1.442695, %v435_v29 }
  0xa0   : > { %719 = vpow2.f32 %v442_v31 }
  0xa1   : > { %721 = vtanh.f32 %v397_v30 }
  0xa2   : > { %v718_v21 = vpop.eup %717 }
  0xa3   : > { %408 = vrot.lane.b32.xlu0 %v718_v21, %s787_s8 }
  0xa6   : > { %v720_v32 = vpop.eup %719 }
  0xa7   : > { %v722_v33 = vpop.eup %721  ;;  %445 = vrot.lane.b32.xlu1 %v720_v32, %s788_s11 }
  0xa8   : > { %v399_v34 = vadd.f32 1.0, %v722_v33 }
  0xaa   : > { %v400_v35 = vmul.f32 0.5, %v399_v34 }
  0xab   : > { %438 = vrot.lane.b32.xlu0 %v436_v24, %s788_s11 }
  0xac   : > { %v406_v38 = vmul.f32 %v404_v22, %v400_v35 }
  0xb3   : > { %457 = vrot.lane.b32.xlu0 %v353_v8, %s788_s11 }
 0x115   : > { %v409_v36 = vpop.permute.xlu0 %408 }
 0x116   : > { %v411_v37 = vmul.f32 %v409_v36, %v400_v35 }
 0x118   : > { %413 = vrot.lane.b32.xlu2 %v411_v37, %s786_s24 }
 0x119   : > { %v446_v47 = vpop.permute.xlu1 %445 }
 0x11d   : > { %v439_v44 = vpop.permute.xlu0 %438 }
 0x125   : > { %v458_v51 = vpop.permute.xlu0 %457 }
 0x172   : > { %v414_v39 = vpop.permute.xlu2 %413 }
 0x173   : > { %v416_v40 = vadd.f32 %v414_v39, %v406_v38 }
 0x175   : > { %723 = vtanh.f32 %v416_v40 }
 0x176   : > { %725 = vrcp.f32 %v791_v56 }
 0x17b   : > { %v724_v41 = vpop.eup %723 }
 0x17c   : > { %419 = vrot.lane.b32.xlu2 %v724_v41, %s789_s12  ;;  %v726_v57 = vpop.eup %725 }
 0x17d   : > { %v469_v58 = vmul.f32 20.0, %v726_v57  ;;  %vm473_vm3 = vweird.f32 %v726_v57 }
 0x17f   : > { %v470_v59 = vsub.f32 1.0, %v469_v58 }
 0x181   : > { %v471_v60 = vmul.f32 %v726_v57, %v470_v59 }
 0x183   : > { %v472_v61 = vadd.f32 %v726_v57, %v471_v60 }
 0x184   : > { %452 = vperm.xlu2 %714, %v449_v42  }
 0x185   : > { %v474_v62 = vsel %vm473_vm3, %v726_v57, %v472_v61 }
 0x1d6   : > { %v420_v43 = vpop.permute.xlu2 %419 }
 0x1d7   : > { %v422_v45 = vmul.f32 %v420_v43, %v400_v35 }
 0x1d9   : > { %v441_v46 = vsub.f32 %v422_v45, %v439_v44 }
 0x1db   : > { %v448_v48 = vmul.f32 %v446_v47, %v441_v46 }
 0x1de   : > { %v453_v49 = vpop.permute.xlu2 %452 }
 0x1df   : > { %v455_v50 = vmul.f32 %v453_v49, %v448_v48 }
 0x1e1   : > { %v456_v52 = vadd.f32 %v455_v50, %v439_v44 }
 0x1e3   : > { %v460_v53 = vadd.f32 %v458_v51, %v456_v52 }
 0x1e5   : > { %462 = vrot.lane.b32.xlu1 %v460_v53, %s790_s14 }
 0x257   : > { %v463_v54 = vpop.permute.xlu1 %462 }
 0x258   : > { %v465_v55 = vsel %vm369_vm2, %v463_v54, 0.0 }
 0x259   : > { %466 = vadd.xlane.f32.xlu2 %v465_v55 }
 0x2cc   : > { %v467_v63 = vpop.xlane.xlu2 %466 }
 0x2cd   : > { %v475_v0 = vmul.f32 %v474_v62, %v467_v63 }
 0x2cf   : > { %v476_v1 = vsub.f32 %v460_v53, %v475_v0 }
 0x2d1   : > { %v477_v2 = vmul.f32 %v476_v1, %v476_v1 }
 0x2d3   : > { %479 = vrot.lane.b32.xlu0 %v477_v2, %s790_s14 }
 0x2db   : > { %500 = vrot.lane.b32.xlu0 %v498_v3, %s788_s11 }
 0x2e3   : > { %506 = vrot.lane.b32.xlu0 %v504_v4, %s788_s11 }
 0x2eb   : > { %516 = vrot.lane.b32.xlu0 %v416_v40, %s792_s15 }
 0x345   : > { %v480_v5 = vpop.permute.xlu0 %479 }
 0x346   : > { %v482_v6 = vsel %vm369_vm2, %v480_v5, 0.0 }
 0x347   : > { %483 = vadd.xlane.f32.xlu1 %v482_v6 }
 0x34d   : > { %v501_v7 = vpop.permute.xlu0 %500 }
 0x355   : > { %v507_v8 = vpop.permute.xlu0 %506 }
 0x35d   : > { %v517_v9 = vpop.permute.xlu0 %516 }
 0x35e   : > { %519 = vst.msk [vmem:[#allocation4] sm:$0xff] %vm369_vm2, %v517_v9 }
 0x35f   : > { %521 = vst.msk [vmem:[#allocation3] sm:$0xff] %vm369_vm2, %v517_v9  ;;  %674 = dma.vmem_to_hbm [thread:$0]  (%p904_p6), %s541_s18, 128, %s543_s21, [#allocation5]  }
 0x3ba   : > { %v484_v10 = vpop.xlane.xlu1 %483 }
 0x3bb   : > { %v485_v11 = vmul.f32 %v484_v10, %v474_v62 }
 0x3bd   : > { %v486_v12 = vadd.f32 1e-05, %v485_v11 }
 0x3bf   : > { %727 = vrsqrt.f32 %v486_v12  ;;  %vm493_vm5 = vweird.f32 %v486_v12 }
 0x3c5   : > { %v728_v13 = vpop.eup %727 }
 0x3c6   : > { %v488_v14 = vmul.f32 %v728_v13, %v486_v12  ;;  %vm494_vm4 = vweird.f32 %v728_v13 }
 0x3c7   : > { %vm495_vm6 = vmor %vm493_vm5, %vm494_vm4 }
 0x3c8   : > { %v489_v15 = vmul.f32 %v728_v13, %v488_v14 }
 0x3ca   : > { %v490_v16 = vmul.f32 0.5, %v489_v15 }
 0x3cc   : > { %v491_v17 = vsub.f32 1.5, %v490_v16 }
 0x3ce   : > { %v492_v18 = vmul.f32 %v728_v13, %v491_v17 }
 0x3d0   : > { %v496_v19 = vsel %vm495_vm6, %v728_v13, %v492_v18 }
 0x3d1   : > { %v497_v20 = vmul.f32 %v496_v19, %v476_v1 }
 0x3d3   : > { %v503_v21 = vmul.f32 %v501_v7, %v497_v20 }
 0x3d5   : > { %v509_v22 = vadd.f32 %v507_v8, %v503_v21 }
 0x3d7   : > { %511 = vrot.lane.b32.xlu0 %v509_v22, %s790_s14 }
 0x449   : > { %v512_v23 = vpop.permute.xlu0 %511 }
 0x44a   : > { %514 = vst.msk [vmem:[%s859_s13] sm:$0xff] %vm369_vm2, %v512_v23 }
 0x44b   : > { %520 = vst.msk [vmem:[#allocation2] sm:$0xff] %vm369_vm2, %v512_v23 }
 0x44c   : > { %770 = dma.done.wait (%p904_p6), [#allocation5], 128  }
 0x44d   : > { %772 = vsyncadd (%p904_p6), [#allocation5], 4294967168 }
 0x44e PF: > { %s19_s26 = sadd.s32 1, %s783_s26   ;;  %s939_s24 = smov %s779_s25 }
 0x44f   : > { %p16_p7 = scmp.ge.s32.totalorder %s19_s26, 14   ;;  %s940_s25 = smov %s942_s28 }
 0x451   :  { %18 = sbr.rel (!%p16_p7) target bundleno = 2 (0x2), region = 94 }
 0x456   :  { %566 = vsyncpa [#allocation5], 1 }
 0x457   :  { %568 = vsyncpa [#allocation5 + $0x1], 1 }

</bundles_post_ra>
